<compile_context>
chip_gen: v5e
topology: v5e:2x2
jax: 0.10.0
libtpu: 0.0.40
codegen_flags: <defaults>
</compile_context>

<pallas_src>
import functools

import jax
import jax.numpy as jnp
from jax.experimental import pallas as pl
from jax.experimental.pallas import tpu as pltpu

ALPHA = 0.5
TAU = 2.0


def _round_up(n, m):
    return ((n + m - 1) // m) * m


def _log_softmax(z):
    m = jnp.max(z, axis=-1, keepdims=True)
    s = z - m
    return s - jnp.log(jnp.sum(jnp.exp(s), axis=-1, keepdims=True))


def _distill_kernel(labels_ref, x_ref, w_ref, b_ref, out_ref, kd_ref,
                    loss_ref, acc_ref, sp_ref, base_ref,
                    *, alpha, tau, c_true, b_true):
    k = pl.program_id(0)
    B, C_s = acc_ref.shape
    neg = jnp.float32(-1e30)

    # ---- first K step: init accumulator + all student-side work (hidden
    #      behind the first W DMA, off the critical path) ----
    @pl.when(k == 0)
    def _():
        acc_ref[...] = jnp.zeros_like(acc_ref)

        lane = jax.lax.broadcasted_iota(jnp.int32, (B, C_s), 1)
        valid = lane < c_true

        # base criterion: mean cross-entropy on the class-token head
        z = jnp.where(valid, out_ref[...], neg)
        log_p = _log_softmax(z)
        onehot = lane == labels_ref[...]
        base_ref[0] = -jnp.sum(jnp.where(onehot, log_p, 0.0)) / float(b_true)

        # student dist-token log-softmax at temperature tau (stashed in VMEM)
        z_kd = jnp.where(valid, kd_ref[...] / tau, neg)
        sp_ref[...] = _log_softmax(z_kd)

    # ---- teacher matmul partial: bf16 operands, f32 accumulation on MXU ----
    acc_ref[...] += jnp.dot(x_ref[...], w_ref[...],
                            preferred_element_type=jnp.float32)

    # ---- last K step: teacher softmax + KL + blend ----
    @pl.when(k == pl.num_programs(0) - 1)
    def _():
        lane = jax.lax.broadcasted_iota(jnp.int32, (B, C_s), 1)
        valid = lane < c_true

        t_logits = jnp.where(valid, acc_ref[...] + b_ref[...], neg)
        zt = t_logits / tau
        mt = jnp.max(zt, axis=-1, keepdims=True)
        st = zt - mt
        et = jnp.exp(st)
        denom = jnp.sum(et, axis=-1, keepdims=True)
        q = et / denom                      # softmax(teacher / T)   (exact)
        logq = st - jnp.log(denom)          # log_softmax(teacher / T)

        # F.kl_div(sp, logq, reduction='sum', log_target=True) * T^2 / numel
        kl_elem = jnp.where(valid, q * (logq - sp_ref[...]), 0.0)
        distill = jnp.sum(kl_elem) * (tau * tau) / float(b_true * c_true)

        loss_ref[0, 0] = base_ref[0] * (1.0 - alpha) + distill * alpha


def make_distillation_loss_fn(teacher_w, teacher_b, *, alpha=ALPHA, tau=TAU,
                              max_batch=1024, block_k=None):
    """Builds a jitted loss fn; the teacher's padded bf16 weight is prepared
    once here and cached on device (teacher is constant)."""
    D, C = teacher_w.shape

    # ---- class streaming width: pad to 128 only if the overhead is small ----
    C_pad128 = _round_up(C, 128)
    if C_pad128 == C or (C_pad128 - C) * 16 <= C:    # <= 6.25% extra W bytes
        C_s = C_pad128                                # lane-dense padded path
    else:
        C_s = C                                       # stream W unpadded in C

    # ---- generation-aware VMEM budget (75% of per-core capacity) ----
    try:
        vmem_cap = int(pltpu.get_tpu_info().vmem_capacity_bytes)
    except Exception:
        vmem_cap = 64 << 20                           # safe on every generation
    budget = int(0.75 * vmem_cap)                     # ~48 MiB v7x, ~96 MiB v5e/v6e

    # ---- auto-size K tile: ~4 MiB W tile, clamped to the VMEM budget ----
    if block_k is None:
        tk_target = _round_up(max((4 << 20) // (2 * C_s), 512), 128)
        resident = 4 * max_batch * C_s * 4 + C_s * 4 + max_batch * 4
        avail = max(budget - resident - (2 << 20), 4 << 20)
        per_tk = 2 * (2 * max_batch) + 3 * (2 * C_s)  # 2 x-bufs + up to 3 W-bufs
        tk_cap = max((avail // per_tk) // 128 * 128, 128)
        tk = min(tk_target, tk_cap)
    else:
        tk = _round_up(block_k, 128)
    tk = max(min(tk, _round_up(D, 128)), 128)

    D_pad = _round_up(D, tk)
    n_k = D_pad // tk
    w_buffers = 3 if n_k >= 3 else 2

    # ---- cache padded bf16 teacher W and f32 bias on device (done once) ----
    w_bf = jnp.pad(teacher_w.astype(jnp.bfloat16),
                   ((0, D_pad - D), (0, C_s - C)))
    b2d = jnp.pad(teacher_b.astype(jnp.float32), (0, C_s - C)).reshape(1, C_s)

    if w_buffers == 3:
        w_spec = pl.BlockSpec((tk, C_s), lambda k: (k, 0),
                              pipeline_mode=pl.Buffered(3))
    else:
        w_spec = pl.BlockSpec((tk, C_s), lambda k: (k, 0))

    def loss_fn(inputs, outputs, outputs_kd, labels):
        B = inputs.shape[0]
        x_flat = inputs.reshape(B, -1)
        assert x_flat.shape[1] == D, "input feature size mismatch with teacher"

        x_bf = jnp.pad(x_flat.astype(jnp.bfloat16), ((0, 0), (0, D_pad - D)))
        out_p = jnp.pad(outputs.astype(jnp.float32), ((0, 0), (0, C_s - C)))
        kd_p = jnp.pad(outputs_kd.astype(jnp.float32), ((0, 0), (0, C_s - C)))
        labels2d = labels.reshape(B, 1).astype(jnp.int32)

        kernel = functools.partial(_distill_kernel, alpha=alpha, tau=tau,
                                   c_true=C, b_true=B)

        grid_spec = pltpu.PrefetchScalarGridSpec(
            num_scalar_prefetch=0,
            grid=(n_k,),
            in_specs=[
                pl.BlockSpec((B, 1), lambda k: (0, 0)),      # labels   (resident)
                pl.BlockSpec((B, tk), lambda k: (0, k)),     # x        (K-tiled bf16)
                w_spec,                                      # teacher W (K-tiled bf16)
                pl.BlockSpec((1, C_s), lambda k: (0, 0)),    # bias     (resident)
                pl.BlockSpec((B, C_s), lambda k: (0, 0)),    # outputs  (resident)
                pl.BlockSpec((B, C_s), lambda k: (0, 0)),    # outputs_kd (resident)
            ],
            out_specs=pl.BlockSpec((1, 1), lambda k: (0, 0),
                                   memory_space=pltpu.MemorySpace.SMEM),
            scratch_shapes=[pltpu.VMEM((B, C_s), jnp.float32),   # teacher acc
                            pltpu.VMEM((B, C_s), jnp.float32),   # stashed sp
                            pltpu.SMEM((1,), jnp.float32)],      # stashed base CE
        )

        # VMEM need: x double-buffer + W buffers + resident f32 operands + scratch.
        need = (2 * (B * tk * 2)
                + w_buffers * (tk * C_s * 2)
                + 2 * (2 * B * C_s * 4 + C_s * 4 + B * 4)
                + 2 * B * C_s * 4
                + (2 << 20))
        vmem_limit = int(min(max(need, 16 << 20), budget))
        vmem_limit = max(vmem_limit, need)

        cost = pl.CostEstimate(
            flops=2 * B * D_pad * C_s,
            transcendentals=5 * B * C_s,
            bytes_accessed=(x_bf.size + w_bf.size) * 2
                           + (out_p.size + kd_p.size + b2d.size) * 4
                           + labels2d.size * 4 + 4,
        )

        loss = pl.pallas_call(
            kernel,
            out_shape=jax.ShapeDtypeStruct((1, 1), jnp.float32),
            grid_spec=grid_spec,
            compiler_params=pltpu.CompilerParams(
                dimension_semantics=("arbitrary",),
                vmem_limit_bytes=vmem_limit,
            ),
            cost_estimate=cost,
        )(labels2d, x_bf, w_bf, b2d, out_p, kd_p)
        return loss[0, 0]

    return jax.jit(loss_fn)


def _reference(inputs, outputs, outputs_kd, labels, teacher_w, teacher_b,
               alpha=ALPHA, tau=TAU):
    # Mirrors the kernel's bf16 streaming of x / teacher_w (f32 accumulation).
    B = inputs.shape[0]
    C = outputs.shape[1]
    x = inputs.reshape(B, -1).astype(jnp.bfloat16).astype(jnp.float32)
    w = teacher_w.astype(jnp.bfloat16).astype(jnp.float32)
    t = x @ w + teacher_b
    log_p = jax.nn.log_softmax(outputs, axis=1)
    base = -jnp.mean(jnp.take_along_axis(log_p, labels[:, None], axis=1))
    sp = jax.nn.log_softmax(outputs_kd / tau, axis=1)
    sq = jax.nn.log_softmax(t / tau, axis=1)
    dist = jnp.sum(jnp.exp(sq) * (sq - sp)) * (tau * tau) / (B * C)
    return base * (1 - alpha) + dist * alpha


if __name__ == "__main__":
    key = jax.random.PRNGKey(0)

    def run_case(case_key, B, C_in, H, W, num_classes, block_k=None):
        k1, k2, k3, k4, k5, k6 = jax.random.split(case_key, 6)
        D = C_in * H * W
        inputs = jax.random.normal(k1, (B, C_in, H, W), jnp.float32)
        outputs = jax.random.normal(k2, (B, num_classes), jnp.float32)     # class token
        outputs_kd = jax.random.normal(k3, (B, num_classes), jnp.float32)  # dist token
        labels = jax.random.randint(k4, (B,), 0, num_classes, jnp.int32)
        teacher_w = 0.02 * jax.random.normal(k5, (D, num_classes), jnp.float32)
        teacher_b = 0.01 * jax.random.normal(k6, (num_classes,), jnp.float32)

        loss_fn = make_distillation_loss_fn(teacher_w, teacher_b,
                                            alpha=ALPHA, tau=TAU,
                                            block_k=block_k)
        loss = loss_fn(inputs, outputs, outputs_kd, labels)
        jax.block_until_ready(loss)

        ref = _reference(inputs, outputs, outputs_kd, labels, teacher_w, teacher_b)
        assert jnp.allclose(loss, ref, rtol=2e-3, atol=2e-3), (loss, ref)

    k_a, k_b = jax.random.split(key)
    # Case 1: C=100 -> W streamed with unpadded class dim; single K step.
    run_case(k_a, B=8, C_in=3, H=16, W=16, num_classes=100)
    # Case 2: C=1000 -> lane-dense 1024 padding; 3 K steps -> Buffered(3) W stream.
    run_case(k_b, B=8, C_in=6, H=16, W=16, num_classes=1000, block_k=512)

    print("KERNEL_OK")
</pallas_src>

<mosaic_0001>
module attributes {stable_mosaic.version = 11 : i64} {
  func.func @_distill_kernel(%arg0: i32, %arg1: memref<8x1xi32, #tpu.memory_space<vmem>>, %arg2: memref<8x768xbf16, #tpu.memory_space<vmem>>, %arg3: memref<768x100xbf16, #tpu.memory_space<vmem>>, %arg4: memref<1x100xf32, #tpu.memory_space<vmem>>, %arg5: memref<8x100xf32, #tpu.memory_space<vmem>>, %arg6: memref<8x100xf32, #tpu.memory_space<vmem>>, %arg7: memref<1x1xf32, #tpu.memory_space<smem>>, %arg8: memref<8x100xf32, #tpu.memory_space<vmem>>, %arg9: memref<8x100xf32, #tpu.memory_space<vmem>>, %arg10: memref<1xf32, #tpu.memory_space<smem>>) attributes {dimension_semantics = [#tpu.dimension_semantics<arbitrary>], iteration_bounds = array<i64: 1>, scalar_prefetch = 0 : i64, scratch_operands = 3 : i64, tpu.core_type = #tpu.core_type<tc>, window_params = [{pipeline_mode = #tpu.pipeline_mode<synchronous>, transform_indices = @transform_0, window_bounds = array<i64: 8, 1>}, {transform_indices = @transform_1, window_bounds = array<i64: 8, 768>}, {transform_indices = @transform_2, window_bounds = array<i64: 768, 100>}, {pipeline_mode = #tpu.pipeline_mode<synchronous>, transform_indices = @transform_3, window_bounds = array<i64: 1, 100>}, {pipeline_mode = #tpu.pipeline_mode<synchronous>, transform_indices = @transform_4, window_bounds = array<i64: 8, 100>}, {pipeline_mode = #tpu.pipeline_mode<synchronous>, transform_indices = @transform_5, window_bounds = array<i64: 8, 100>}, {transform_indices = @transform_6, window_bounds = array<i64: 1, 1>}]} {
    %c0_i32 = arith.constant 0 : i32
    %0 = arith.cmpi eq, %arg0, %c0_i32 : i32
    %1 = arith.extui %0 : i1 to i32
    %cst = arith.constant -1.000000e+30 : f32
    %c0_i32_0 = arith.constant 0 : i32
    %2 = arith.cmpi ne, %1, %c0_i32_0 : i32
    scf.if %2 {
      %cst_12 = arith.constant 0.000000e+00 : f32
      %12 = vector.broadcast %cst_12 : f32 to vector<8x100xf32>
      %c0_13 = arith.constant 0 : index
      %c0_14 = arith.constant 0 : index
      %13 = vector.load %arg8[%c0_13, %c0_14] : memref<8x100xf32, #tpu.memory_space<vmem>>, vector<8x100xf32>
      tpu.vector_store %arg8[%c0_13, %c0_14], %12 {strides = array<i32>} : memref<8x100xf32, #tpu.memory_space<vmem>>, vector<8x100xf32>,
      %14 = tpu.iota {dimensions = array<i32: 1>} : vector<8x100xi32>
      %c100_i32 = arith.constant 100 : i32
      %15 = vector.broadcast %c100_i32 : i32 to vector<8x100xi32>
      %16 = arith.cmpi slt, %14, %15 : vector<8x100xi32>
      %c0_15 = arith.constant 0 : index
      %c0_16 = arith.constant 0 : index
      %17 = vector.load %arg5[%c0_15, %c0_16] : memref<8x100xf32, #tpu.memory_space<vmem>>, vector<8x100xf32>
      %18 = vector.broadcast %cst : f32 to vector<8x100xf32>
      %19 = arith.select %16, %17, %18 : vector<8x100xi1>, vector<8x100xf32>
      %cst_17 = arith.constant dense<0xFF800000> : vector<8xf32>
      %20 = vector.multi_reduction <maximumf>, %19, %cst_17 [1] : vector<8x100xf32> to vector<8xf32>
      %21 = vector.shape_cast %20 : vector<8xf32> to vector<8x1xf32>
      %22 = vector.broadcast %21 : vector<8x1xf32> to vector<8x100xf32>
      %23 = arith.subf %19, %22 : vector<8x100xf32>
      %24 = math.exp %23 : vector<8x100xf32>
      %cst_18 = arith.constant dense<0.000000e+00> : vector<8xf32>
      %25 = vector.multi_reduction <add>, %24, %cst_18 [1] : vector<8x100xf32> to vector<8xf32>
      %26 = vector.shape_cast %25 : vector<8xf32> to vector<8x1xf32>
      %27 = math.log %26 : vector<8x1xf32>
      %28 = vector.broadcast %27 : vector<8x1xf32> to vector<8x100xf32>
      %29 = arith.subf %23, %28 : vector<8x100xf32>
      %c0_19 = arith.constant 0 : index
      %c0_20 = arith.constant 0 : index
      %30 = vector.load %arg1[%c0_19, %c0_20] : memref<8x1xi32, #tpu.memory_space<vmem>>, vector<8x1xi32>
      %31 = vector.broadcast %30 : vector<8x1xi32> to vector<8x100xi32>
      %32 = arith.cmpi eq, %14, %31 : vector<8x100xi32>
      %cst_21 = arith.constant 0.000000e+00 : f32
      %33 = vector.broadcast %cst_21 : f32 to vector<8x100xf32>
      %34 = arith.select %32, %29, %33 : vector<8x100xi1>, vector<8x100xf32>
      %35 = vector.shape_cast %34 : vector<8x100xf32> to vector<1x8x100xf32>
      %cst_22 = arith.constant dense<0.000000e+00> : vector<1xf32>
      %36 = vector.multi_reduction <add>, %35, %cst_22 [1, 2] : vector<1x8x100xf32> to vector<1xf32>
      %37 = vector.shape_cast %36 : vector<1xf32> to vector<1x1x1xf32>
      %38 = vector.extract %37[0, 0, 0] : f32 from vector<1x1x1xf32>
      %cst_23 = arith.constant 0.000000e+00 : f32
      %39 = arith.subf %cst_23, %38 : f32
      %cst_24 = arith.constant 8.000000e+00 : f32
      %40 = arith.divf %39, %cst_24 : f32
      %c0_25 = arith.constant 0 : index
      %41 = memref.load %arg10[%c0_25] : memref<1xf32, #tpu.memory_space<smem>>
      memref.store %40, %arg10[%c0_25] : memref<1xf32, #tpu.memory_space<smem>>
      %c0_26 = arith.constant 0 : index
      %c0_27 = arith.constant 0 : index
      %42 = vector.load %arg6[%c0_26, %c0_27] : memref<8x100xf32, #tpu.memory_space<vmem>>, vector<8x100xf32>
      %cst_28 = arith.constant 2.000000e+00 : f32
      %43 = vector.broadcast %cst_28 : f32 to vector<8x100xf32>
      %44 = arith.divf %42, %43 : vector<8x100xf32>
      %45 = vector.broadcast %cst : f32 to vector<8x100xf32>
      %46 = arith.select %16, %44, %45 : vector<8x100xi1>, vector<8x100xf32>
      %cst_29 = arith.constant dense<0xFF800000> : vector<8xf32>
      %47 = vector.multi_reduction <maximumf>, %46, %cst_29 [1] : vector<8x100xf32> to vector<8xf32>
      %48 = vector.shape_cast %47 : vector<8xf32> to vector<8x1xf32>
      %49 = vector.broadcast %48 : vector<8x1xf32> to vector<8x100xf32>
      %50 = arith.subf %46, %49 : vector<8x100xf32>
      %51 = math.exp %50 : vector<8x100xf32>
      %cst_30 = arith.constant dense<0.000000e+00> : vector<8xf32>
      %52 = vector.multi_reduction <add>, %51, %cst_30 [1] : vector<8x100xf32> to vector<8xf32>
      %53 = vector.shape_cast %52 : vector<8xf32> to vector<8x1xf32>
      %54 = math.log %53 : vector<8x1xf32>
      %55 = vector.broadcast %54 : vector<8x1xf32> to vector<8x100xf32>
      %56 = arith.subf %50, %55 : vector<8x100xf32>
      %c0_31 = arith.constant 0 : index
      %c0_32 = arith.constant 0 : index
      %57 = vector.load %arg9[%c0_31, %c0_32] : memref<8x100xf32, #tpu.memory_space<vmem>>, vector<8x100xf32>
      tpu.vector_store %arg9[%c0_31, %c0_32], %56 {strides = array<i32>} : memref<8x100xf32, #tpu.memory_space<vmem>>, vector<8x100xf32>,
    } else {
    }
    %c0 = arith.constant 0 : index
    %c0_1 = arith.constant 0 : index
    %3 = vector.load %arg8[%c0, %c0_1] : memref<8x100xf32, #tpu.memory_space<vmem>>, vector<8x100xf32>
    %c0_2 = arith.constant 0 : index
    %c0_3 = arith.constant 0 : index
    %4 = vector.load %arg2[%c0_2, %c0_3] : memref<8x768xbf16, #tpu.memory_space<vmem>>, vector<8x768xbf16>
    %c0_4 = arith.constant 0 : index
    %c0_5 = arith.constant 0 : index
    %5 = vector.load %arg3[%c0_4, %c0_5] : memref<768x100xbf16, #tpu.memory_space<vmem>>, vector<768x100xbf16>
    %cst_6 = arith.constant dense<0.000000e+00> : vector<8x100xf32>
    %6 = tpu.matmul %4, %5, %cst_6 {dimension_numbers = #tpu.dot_dimension_numbers<[1], [0], [0], [1], [0, 0, 1, 1], [], []>} : vector<8x768xbf16>, vector<768x100xbf16>, vector<8x100xf32> -> vector<8x100xf32>
    %7 = arith.addf %3, %6 : vector<8x100xf32>
    %c0_7 = arith.constant 0 : index
    %c0_8 = arith.constant 0 : index
    %8 = vector.load %arg8[%c0_7, %c0_8] : memref<8x100xf32, #tpu.memory_space<vmem>>, vector<8x100xf32>
    tpu.vector_store %arg8[%c0_7, %c0_8], %7 {strides = array<i32>} : memref<8x100xf32, #tpu.memory_space<vmem>>, vector<8x100xf32>,
    %c0_i32_9 = arith.constant 0 : i32
    %9 = arith.cmpi eq, %arg0, %c0_i32_9 : i32
    %10 = arith.extui %9 : i1 to i32
    %cst_10 = arith.constant -1.000000e+30 : f32
    %c0_i32_11 = arith.constant 0 : i32
    %11 = arith.cmpi ne, %10, %c0_i32_11 : i32
    scf.if %11 {
      %12 = tpu.iota {dimensions = array<i32: 1>} : vector<8x100xi32>
      %c100_i32 = arith.constant 100 : i32
      %13 = vector.broadcast %c100_i32 : i32 to vector<8x100xi32>
      %14 = arith.cmpi slt, %12, %13 : vector<8x100xi32>
      %c0_12 = arith.constant 0 : index
      %c0_13 = arith.constant 0 : index
      %15 = vector.load %arg8[%c0_12, %c0_13] : memref<8x100xf32, #tpu.memory_space<vmem>>, vector<8x100xf32>
      %c0_14 = arith.constant 0 : index
      %c0_15 = arith.constant 0 : index
      %16 = vector.load %arg4[%c0_14, %c0_15] : memref<1x100xf32, #tpu.memory_space<vmem>>, vector<1x100xf32>
      %17 = vector.broadcast %16 : vector<1x100xf32> to vector<8x100xf32>
      %18 = arith.addf %15, %17 : vector<8x100xf32>
      %19 = vector.broadcast %cst_10 : f32 to vector<8x100xf32>
      %20 = arith.select %14, %18, %19 : vector<8x100xi1>, vector<8x100xf32>
      %cst_16 = arith.constant 2.000000e+00 : f32
      %21 = vector.broadcast %cst_16 : f32 to vector<8x100xf32>
      %22 = arith.divf %20, %21 : vector<8x100xf32>
      %cst_17 = arith.constant dense<0xFF800000> : vector<8xf32>
      %23 = vector.multi_reduction <maximumf>, %22, %cst_17 [1] : vector<8x100xf32> to vector<8xf32>
      %24 = vector.shape_cast %23 : vector<8xf32> to vector<8x1xf32>
      %25 = vector.broadcast %24 : vector<8x1xf32> to vector<8x100xf32>
      %26 = arith.subf %22, %25 : vector<8x100xf32>
      %27 = math.exp %26 : vector<8x100xf32>
      %cst_18 = arith.constant dense<0.000000e+00> : vector<8xf32>
      %28 = vector.multi_reduction <add>, %27, %cst_18 [1] : vector<8x100xf32> to vector<8xf32>
      %29 = vector.shape_cast %28 : vector<8xf32> to vector<8x1xf32>
      %30 = vector.broadcast %29 : vector<8x1xf32> to vector<8x100xf32>
      %31 = arith.divf %27, %30 : vector<8x100xf32>
      %32 = math.log %29 : vector<8x1xf32>
      %33 = vector.broadcast %32 : vector<8x1xf32> to vector<8x100xf32>
      %34 = arith.subf %26, %33 : vector<8x100xf32>
      %c0_19 = arith.constant 0 : index
      %c0_20 = arith.constant 0 : index
      %35 = vector.load %arg9[%c0_19, %c0_20] : memref<8x100xf32, #tpu.memory_space<vmem>>, vector<8x100xf32>
      %36 = arith.subf %34, %35 : vector<8x100xf32>
      %37 = arith.mulf %31, %36 : vector<8x100xf32>
      %cst_21 = arith.constant 0.000000e+00 : f32
      %38 = vector.broadcast %cst_21 : f32 to vector<8x100xf32>
      %39 = arith.select %14, %37, %38 : vector<8x100xi1>, vector<8x100xf32>
      %40 = vector.shape_cast %39 : vector<8x100xf32> to vector<1x8x100xf32>
      %cst_22 = arith.constant dense<0.000000e+00> : vector<1xf32>
      %41 = vector.multi_reduction <add>, %40, %cst_22 [1, 2] : vector<1x8x100xf32> to vector<1xf32>
      %42 = vector.shape_cast %41 : vector<1xf32> to vector<1x1x1xf32>
      %43 = vector.extract %42[0, 0, 0] : f32 from vector<1x1x1xf32>
      %cst_23 = arith.constant 4.000000e+00 : f32
      %44 = arith.mulf %43, %cst_23 : f32
      %cst_24 = arith.constant 8.000000e+02 : f32
      %45 = arith.divf %44, %cst_24 : f32
      %c0_25 = arith.constant 0 : index
      %46 = memref.load %arg10[%c0_25] : memref<1xf32, #tpu.memory_space<smem>>
      %cst_26 = arith.constant 5.000000e-01 : f32
      %47 = arith.mulf %46, %cst_26 : f32
      %cst_27 = arith.constant 5.000000e-01 : f32
      %48 = arith.mulf %45, %cst_27 : f32
      %49 = arith.addf %47, %48 : f32
      %c0_28 = arith.constant 0 : index
      %c0_29 = arith.constant 0 : index
      %50 = memref.load %arg7[%c0_28, %c0_29] : memref<1x1xf32, #tpu.memory_space<smem>>
      memref.store %49, %arg7[%c0_28, %c0_29] : memref<1x1xf32, #tpu.memory_space<smem>>
    } else {
    }
    return
  }
  func.func @transform_0(%arg0: i32) -> (i32, i32) {
    %c0_i32 = arith.constant 0 : i32
    %c0_i32_0 = arith.constant 0 : i32
    %c0_i32_1 = arith.constant 0 : i32
    return %c0_i32, %c0_i32_0 : i32, i32
  }
  func.func @transform_1(%arg0: i32) -> (i32, i32) {
    %c0_i32 = arith.constant 0 : i32
    %c0_i32_0 = arith.constant 0 : i32
    return %c0_i32, %arg0 : i32, i32
  }
  func.func @transform_2(%arg0: i32) -> (i32, i32) {
    %c0_i32 = arith.constant 0 : i32
    %c0_i32_0 = arith.constant 0 : i32
    return %arg0, %c0_i32 : i32, i32
  }
  func.func @transform_3(%arg0: i32) -> (i32, i32) {
    %c0_i32 = arith.constant 0 : i32
    %c0_i32_0 = arith.constant 0 : i32
    %c0_i32_1 = arith.constant 0 : i32
    return %c0_i32, %c0_i32_0 : i32, i32
  }
  func.func @transform_4(%arg0: i32) -> (i32, i32) {
    %c0_i32 = arith.constant 0 : i32
    %c0_i32_0 = arith.constant 0 : i32
    %c0_i32_1 = arith.constant 0 : i32
    return %c0_i32, %c0_i32_0 : i32, i32
  }
  func.func @transform_5(%arg0: i32) -> (i32, i32) {
    %c0_i32 = arith.constant 0 : i32
    %c0_i32_0 = arith.constant 0 : i32
    %c0_i32_1 = arith.constant 0 : i32
    return %c0_i32, %c0_i32_0 : i32, i32
  }
  func.func @transform_6(%arg0: i32) -> (i32, i32) {
    %c0_i32 = arith.constant 0 : i32
    %c0_i32_0 = arith.constant 0 : i32
    %c0_i32_1 = arith.constant 0 : i32
    return %c0_i32, %c0_i32_0 : i32, i32
  }
}

</mosaic_0001>

<bundles_post_ra>
// kernel: loss_fn.1
= control target key start
LH: loop header
LB: loop body
LE: loop exit
PB: predicated region body
PF: predicated region fallthrough
CT: control target
= control target key end

     0   :  { %v971_v16 = vmov 2.0   ;;  %s1207_s0 = inlined_call_operand.vmem [shape: s32[8,1], index: 0, kind: input, shape index: {}]   ;;  %s1208_s1 = inlined_call_operand.vmem [shape: bf16[8,768], index: 1, kind: input, shape index: {}]   ;;  %s1209_s2 = inlined_call_operand.vmem [shape: bf16[768,100], index: 2, kind: input, shape index: {}]   ;;  %s1210_s3 = inlined_call_operand.vmem [shape: f32[1,100], index: 3, kind: input, shape index: {}]   ;;  %s1211_s4 = inlined_call_operand.vmem [shape: f32[8,100], index: 4, kind: input, shape index: {}]   ;;  %s1212_s5 = inlined_call_operand.vmem [shape: f32[8,100], index: 5, kind: input, shape index: {}]   ;;  %s1213_s6 = inlined_call_operand.hbm [shape: f32[1,1], index: 6, kind: output, shape index: {}]  }
   0x1   :  { %v880_v0 = vld [vmem:[%s1209_s2 + $0x38] sm:$0xff]  ;;  %v879_v2 = vld [vmem:[%s1209_s2 + $0x30] sm:$0xff]  ;;  %v878_v8 = vld [vmem:[%s1209_s2 + $0x28] sm:$0xff]  ;;  %937 = vrcp.f32 %v971_v16 }
   0x2   :  { %v888_v1 = vld [vmem:[%s1209_s2 + $0x78] sm:$0xff]  ;;  %507 = vmatpush.bf16.msra.mxu0 %v880_v0  ;;  %v887_v3 = vld [vmem:[%s1209_s2 + $0x70] sm:$0xff]  ;;  %v886_v9 = vld [vmem:[%s1209_s2 + $0x68] sm:$0xff] }
   0x3   :  { %520 = vmatpush.bf16.msra.mxu1 %v888_v1  ;;  %v896_v4 = vld [vmem:[%s1209_s2 + $0xb8] sm:$0xff]  ;;  %v895_v6 = vld [vmem:[%s1209_s2 + $0xb0] sm:$0xff]  ;;  %v894_v10 = vld [vmem:[%s1209_s2 + $0xa8] sm:$0xff] }
   0x4   :  { %v904_v5 = vld [vmem:[%s1209_s2 + $0xf8] sm:$0xff]  ;;  %533 = vmatpush.bf16.msra.mxu2 %v896_v4  ;;  %v903_v7 = vld [vmem:[%s1209_s2 + $0xf0] sm:$0xff]  ;;  %v902_v11 = vld [vmem:[%s1209_s2 + $0xe8] sm:$0xff] }
   0x5   :  { %546 = vmatpush.bf16.msra.mxu3 %v904_v5  ;;  %v877_v12 = vld [vmem:[%s1209_s2 + $0x20] sm:$0xff]  ;;  %v876_v17 = vld [vmem:[%s1209_s2 + $0x18] sm:$0xff] }
   0x6   :  { %508 = vmatpush.bf16.msra.mxu0 %v879_v2  ;;  %v885_v13 = vld [vmem:[%s1209_s2 + $0x60] sm:$0xff]  ;;  %v884_v18 = vld [vmem:[%s1209_s2 + $0x58] sm:$0xff] }
   0x7   :  { %521 = vmatpush.bf16.msra.mxu1 %v887_v3  ;;  %v893_v14 = vld [vmem:[%s1209_s2 + $0xa0] sm:$0xff] }
   0x8   :  { %534 = vmatpush.bf16.msra.mxu2 %v895_v6  ;;  %v901_v15 = vld [vmem:[%s1209_s2 + $0xe0] sm:$0xff] }
   0x9   :  { %547 = vmatpush.bf16.msra.mxu3 %v903_v7 }
   0xa   :  { %509 = vmatpush.bf16.msra.mxu0 %v878_v8 }
   0xb   :  { %522 = vmatpush.bf16.msra.mxu1 %v886_v9 }
   0xc   :  { %535 = vmatpush.bf16.msra.mxu2 %v894_v10 }
   0xd   :  { %548 = vmatpush.bf16.msra.mxu3 %v902_v11 }
   0xe   :  { %510 = vmatpush.bf16.msra.mxu0 %v877_v12 }
   0xf   :  { %523 = vmatpush.bf16.msra.mxu1 %v885_v13 }
  0x10   :  { %11 = vsyncpa [#allocation6], 0  ;;  %536 = vmatpush.bf16.msra.mxu2 %v893_v14  ;;  %v892_v19 = vld [vmem:[%s1209_s2 + $0x98] sm:$0xff]  ;;  %v875_v21 = vld [vmem:[%s1209_s2 + $0x10] sm:$0xff]  ;;  %v938_v23 = vpop.eup %937  ;;  %v30_v39 = vlaneseq  ;;  %vm28_vm1 = vcmask 818176   ;;  %s671_s14 = sshll.u32 %s1213_s6, 4  ;;  %s672_s14 = int_to_ptr.hbm [resolvable:$true] %s671_s14 }
  0x11   :  { %549 = vmatpush.bf16.msra.mxu3 %v901_v15  ;;  %v900_v20 = vld [vmem:[%s1209_s2 + $0xd8] sm:$0xff]  ;;  %v883_v22 = vld [vmem:[%s1209_s2 + $0x50] sm:$0xff]  ;;  %v77_v26 = vmul.f32 2.0, %v938_v23  ;;  %v874_v27 = vld [vmem:[%s1209_s2 + $0x8] sm:$0xff]  ;;  %vm81_vm0 = vweird.f32 %v938_v23  ;;  %s976_s18 = smov [#allocation5]  }
  0x12   :  { %511 = vmatpush.bf16.msra.mxu0 %v876_v17  ;;  %v891_v24 = vld [vmem:[%s1209_s2 + $0x90] sm:$0xff]  ;;  %v882_v28 = vld [vmem:[%s1209_s2 + $0x48] sm:$0xff]  ;;  %v99_v29 = vld [vmem:[%s1208_s1] sm:$0xff]  ;;  %v1120_v47 = vand.u32 127, %v30_v39 }
  0x13   :  { %524 = vmatpush.bf16.msra.mxu1 %v884_v18  ;;  %v899_v25 = vld [vmem:[%s1209_s2 + $0xd0] sm:$0xff]  ;;  %v78_v30 = vsub.f32 1.0, %v77_v26  ;;  %v890_v31 = vld [vmem:[%s1209_s2 + $0x88] sm:$0xff]  ;;  %v201_v34 = vunpack.c.l.b16 %v99_v29  ;;  %v202_v35 = vunpack.c.h.b16 %v99_v29  ;;  %v873_v37 = vld [vmem:[%s1209_s2] sm:$0xff]  ;;  %v972_v18 = vmov 0.0  }
  0x14   :  { %537 = vmatpush.bf16.msra.mxu2 %v892_v19  ;;  %v898_v32 = vld [vmem:[%s1209_s2 + $0xc8] sm:$0xff]  ;;  %v881_v38 = vld [vmem:[%s1209_s2 + $0x40] sm:$0xff]  ;;  %v912_v41 = vld [vmem:[%s1209_s2 + $0x138] sm:$0xff]  ;;  %vm32_vm2 = vcmp.lt.s32.totalorder %v1120_v47, 100  ;;  %29 = vst.msk [vmem:[#allocation2] sm:$0xff] %vm28_vm1, %v972_v18 }
  0x15   :  { %550 = vmatpush.bf16.msra.mxu3 %v900_v20  ;;  %v79_v33 = vmul.f32 %v938_v23, %v78_v30  ;;  %v100_v36 = vld [vmem:[%s1208_s1 + $0x8] sm:$0xff]  ;;  %v920_v42 = vld [vmem:[%s1209_s2 + $0x178] sm:$0xff]  ;;  %v889_v43 = vld [vmem:[%s1209_s2 + $0x80] sm:$0xff]  ;;  %v207_v50 = vpack.c.b16 %v201_v34, %v201_v34  ;;  %v208_v51 = vpack.c.b16 %v202_v35, %v202_v35 }
  0x16   :  { %512 = vmatpush.bf16.msra.mxu0 %v875_v21  ;;  %v897_v44 = vld [vmem:[%s1209_s2 + $0xc0] sm:$0xff]  ;;  %v203_v45 = vunpack.c.l.b16 %v100_v36  ;;  %v204_v46 = vunpack.c.h.b16 %v100_v36  ;;  %v911_v53 = vld [vmem:[%s1209_s2 + $0x130] sm:$0xff]  ;;  %v910_v59 = vld [vmem:[%s1209_s2 + $0x128] sm:$0xff] }
  0x17   :  { %525 = vmatpush.bf16.msra.mxu1 %v883_v22  ;;  %v80_v40 = vadd.f32 %v938_v23, %v79_v33  ;;  %v75_v48 = vld [vmem:[%s1212_s5] sm:$0xff]  ;;  %v919_v54 = vld [vmem:[%s1209_s2 + $0x170] sm:$0xff]  ;;  %v918_v60 = vld [vmem:[%s1209_s2 + $0x168] sm:$0xff] }
  0x18   :  { %538 = vmatpush.bf16.msra.mxu2 %v891_v24  ;;  %v209_v56 = vpack.c.b16 %v203_v45, %v203_v45  ;;  %v210_v57 = vpack.c.b16 %v204_v46, %v204_v46  ;;  %v909_v61 = vld [vmem:[%s1209_s2 + $0x120] sm:$0xff]  ;;  %v908_v63 = vld [vmem:[%s1209_s2 + $0x118] sm:$0xff]  ;;  %v907_v1 = vld [vmem:[%s1209_s2 + $0x110] sm:$0xff] }
  0x19   :  { %551 = vmatpush.bf16.msra.mxu3 %v899_v25  ;;  %v1125_v49 = vsel %vm81_vm0, %v938_v23, %v80_v40  ;;  %v917_v62 = vld [vmem:[%s1209_s2 + $0x160] sm:$0xff]  ;;  %v916_v0 = vld [vmem:[%s1209_s2 + $0x158] sm:$0xff]  ;;  %v915_v2 = vld [vmem:[%s1209_s2 + $0x150] sm:$0xff] }
  0x1a   :  { %513 = vmatpush.bf16.msra.mxu0 %v874_v27  ;;  %v83_v52 = vmul.f32 %v1125_v49, %v75_v48  ;;  %v906_v3 = vld [vmem:[%s1209_s2 + $0x108] sm:$0xff]  ;;  %v101_v5 = vld [vmem:[%s1208_s1 + $0x10] sm:$0xff]  ;;  %v905_v8 = vld [vmem:[%s1209_s2 + $0x100] sm:$0xff] }
  0x1b   :  { %526 = vmatpush.bf16.msra.mxu1 %v882_v28  ;;  %v914_v4 = vld [vmem:[%s1209_s2 + $0x148] sm:$0xff]  ;;  %v205_v6 = vunpack.c.l.b16 %v101_v5  ;;  %v206_v7 = vunpack.c.h.b16 %v101_v5  ;;  %v913_v9 = vld [vmem:[%s1209_s2 + $0x140] sm:$0xff] }
  0x1c   :  { %539 = vmatpush.bf16.msra.mxu2 %v890_v31  ;;  %v84_v55 = vsel %vm32_vm2, %v83_v52, -1e+30  ;;  %v33_v12 = vld [vmem:[%s1211_s4] sm:$0xff] }
  0x1d   :  { %552 = vmatpush.bf16.msra.mxu3 %v898_v32  ;;  %v85_v58 = vsel %vm28_vm1, %v84_v55, -inf  ;;  %v211_v10 = vpack.c.b16 %v205_v6, %v205_v6  ;;  %v212_v11 = vpack.c.b16 %v206_v7, %v206_v7  ;;  %v34_v13 = vsel %vm32_vm2, %v33_v12, -1e+30  ;;  %v98_v35 = vld [vmem:[#allocation2] sm:$0xff] }
  0x1e   :  { %514 = vmatpush.bf16.msra.mxu0 %v873_v37  ;;  %86 = vmax.xlane.f32.xlu0 %v85_v58  ;;  %v35_v14 = vsel %vm28_vm1, %v34_v13, -inf  ;;  %v936_v40 = vld [vmem:[%s1210_s3] ss:$0 sm:$0xff] }
  0x1f   :  { %527 = vmatpush.bf16.msra.mxu1 %v881_v38  ;;  %36 = vmax.xlane.f32.xlu1 %v35_v14 }
  0x20   :  { %540 = vmatpush.bf16.msra.mxu2 %v889_v43 }
  0x21   :  { %553 = vmatpush.bf16.msra.mxu3 %v897_v44  ;;  %515 = vmatmul.bf16.vlgmr.msra.gmra.mxu0 %v207_v50 }
  0x22   :  { %559 = vmatpush.bf16.msrb.mxu0 %v912_v41  ;;  %528 = vmatmul.bf16.vlgmr.msra.gmra.mxu1 %v208_v51 }
  0x23   :  { %572 = vmatpush.bf16.msrb.mxu1 %v920_v42  ;;  %541 = vmatmul.bf16.vlgmr.msra.gmra.mxu2 %v209_v56 }
  0x24   :  { %554 = vmatmul.bf16.vlgmr.msra.gmra.mxu3 %v210_v57 }
  0x26   :  { %560 = vmatpush.bf16.msrb.mxu0 %v911_v53  ;;  %v47_v53 = vld [vmem:[%s1207_s0] sm:$0xff] }
  0x27   :  { %573 = vmatpush.bf16.msrb.mxu1 %v919_v54  ;;  %v973_v54 = vmov 0  }
  0x28   :  { %935 = vset.pattern.permute.xlu0 %v973_v54 }
  0x2a   :  { %561 = vmatpush.bf16.msrb.mxu0 %v910_v59 }
  0x2b   :  { %574 = vmatpush.bf16.msrb.mxu1 %v918_v60 }
  0x2e   :  { %562 = vmatpush.bf16.msrb.mxu0 %v909_v61 }
  0x2f   :  { %575 = vmatpush.bf16.msrb.mxu1 %v917_v62 }
  0x32   :  { %563 = vmatpush.bf16.msrb.mxu0 %v908_v63 }
  0x33   :  { %576 = vmatpush.bf16.msrb.mxu1 %v916_v0 }
  0x36   :  { %564 = vmatpush.bf16.msrb.mxu0 %v907_v1 }
  0x37   :  { %577 = vmatpush.bf16.msrb.mxu1 %v915_v2 }
  0x3a   :  { %565 = vmatpush.bf16.msrb.mxu0 %v906_v3 }
  0x3b   :  { %578 = vmatpush.bf16.msrb.mxu1 %v914_v4 }
  0x3e   :  { %566 = vmatpush.bf16.msrb.mxu0 %v905_v8 }
  0x3f   :  { %579 = vmatpush.bf16.msrb.mxu1 %v913_v9 }
  0x41   :  { %567 = vmatmul.bf16.vlgmr.msrb.gmra.mxu0 %v211_v10 }
  0x42   :  { %580 = vmatmul.bf16.vlgmr.msrb.gmra.mxu1 %v212_v11 }
  0x91   :  { %v87_v15 = vpop.xlane.xlu0 %86 }
  0x92   :  { %v88_v16 = vsub.f32 %v84_v55, %v87_v15  ;;  %v37_v46 = vpop.xlane.xlu1 %36 }
  0x94   :  { %v89_v17 = vmul.f32 1.442695, %v88_v16 }
  0x96   :  { %939 = vpow2.f32 %v89_v17 }
  0x9c   :  { %v940_v21 = vpop.eup %939 }
  0x9d   :  { %v91_v22 = vsel %vm28_vm1, %v940_v21, 0.0 }
  0x9e   :  { %v516_v19 = vpop.f32.mrf.mxu0  ;;  %92 = vadd.xlane.f32.xlu1 %v91_v22 }
  0x9f   :  { %v529_v20 = vpop.f32.mrf.mxu1 }
  0xa0   :  { %v530_v29 = vadd.f32 %v529_v20, %v516_v19 }
  0xa6   :  { %v518_v23 = vpop.f32.mrf.mxu0  ;;  %v542_v25 = vpop.f32.mrf.mxu2 }
  0xa7   :  { %v531_v24 = vpop.f32.mrf.mxu1  ;;  %v555_v26 = vpop.f32.mrf.mxu3  ;;  %v543_v30 = vadd.f32 %v542_v25, %v530_v29 }
  0xa9   :  { %v556_v31 = vadd.f32 %v555_v26, %v543_v30  ;;  %v974_v26 = vmov 8.0  }
  0xae   :  { %v544_v27 = vpop.f32.mrf.mxu2 }
  0xaf   :  { %v557_v28 = vpop.f32.mrf.mxu3  ;;  %v975_v27 = vmov 800.0  }
  0xbe   :  { %v568_v32 = vpop.f32.mrf.mxu0 }
  0xbf   :  { %v581_v33 = vpop.f32.mrf.mxu1  ;;  %v569_v34 = vadd.f32 %v568_v32, %v556_v31 }
  0xc1   :  { %v582_v36 = vadd.f32 %v581_v33, %v569_v34 }
  0xc3   :  { %v585_v37 = vadd.f32 %v582_v36, %v98_v35 }
  0xc5   :  { %587 = vst.msk [vmem:[#allocation2] sm:$0xff] %vm28_vm1, %v585_v37 }
  0xc6   :  { %v570_v38 = vpop.f32.mrf.mxu0 }
  0xc7   :  { %v583_v39 = vpop.f32.mrf.mxu1 }
  0xcc   :  { %v594_v41 = vld [vmem:[#allocation2] sm:$0xff] }
  0xcd   :  { %v599_v42 = vadd.f32 %v936_v40, %v594_v41 }
  0xcf   :  { %v600_v43 = vsel %vm32_vm2, %v599_v42, -1e+30 }
  0xd0   :  { %v608_v44 = vmul.f32 %v600_v43, %v1125_v49  ;;  %v38_v49 = vsub.f32 %v34_v13, %v37_v46 }
  0xd2   :  { %v609_v45 = vsel %vm28_vm1, %v608_v44, -inf  ;;  %v39_v58 = vmul.f32 1.442695, %v38_v49 }
  0xd3   :  { %610 = vmax.xlane.f32.xlu0 %v609_v45 }
  0xe7   :  { %49 = vperm.xlu0 %935, %v47_v53  }
 0x111   :  { %v93_v48 = vpop.xlane.xlu1 %92 }
 0x112   :  { %941 = vlog2.f32 %v93_v48 }
 0x118   :  { %v942_v50 = vpop.eup %941 }
 0x119   :  { %v95_v51 = vmul.f32 0.6931472, %v942_v50 }
 0x11b   :  { %v96_v52 = vsub.f32 %v88_v16, %v95_v51 }
 0x11d   :  { %97 = vst.msk [vmem:[#allocation3] sm:$0xff] %vm28_vm1, %v96_v52 }
 0x124   :  { %v636_v17 = vld [vmem:[#allocation3] sm:$0xff] }
 0x146   :  { %v611_v55 = vpop.xlane.xlu0 %610 }
 0x147   :  { %v612_v56 = vsub.f32 %v608_v44, %v611_v55 }
 0x149   :  { %v613_v57 = vmul.f32 1.442695, %v612_v56 }
 0x14b   :  { %943 = vpow2.f32 %v613_v57 }
 0x14c   :  { %945 = vpow2.f32 %v39_v58 }
 0x151   :  { %v944_v59 = vpop.eup %943 }
 0x152   :  { %v615_v60 = vsel %vm28_vm1, %v944_v59, 0.0  ;;  %v946_v61 = vpop.eup %945 }
 0x153   :  { %616 = vadd.xlane.f32.xlu2 %v615_v60  ;;  %v41_v62 = vsel %vm28_vm1, %v946_v61, 0.0 }
 0x159   :  { %v50_v9 = vpop.permute.xlu0 %49 }
 0x15a   :  { %vm51_vm7 = vcmp.eq.s32.totalorder %v1120_v47, %v50_v9 }
 0x15b   :  { %42 = vadd.xlane.f32.xlu2 %v41_v62 }
 0x1c6   :  { %v617_v63 = vpop.xlane.xlu2 %616 }
 0x1c7   :  { %947 = vrcp.f32 %v617_v63  ;;  %v629_v6 = vand.u32 2147483648, %v617_v63  ;;  %v627_v8 = vand.u32 2147483647, %v617_v63  ;;  %vm623_vm4 = vweird.f32 %v617_v63 }
 0x1c8   :  { %949 = vlog2.f32 %v617_v63 }
 0x1c9   :  { %v630_v13 = vor.u32 1.1754944e-38, %v629_v6  ;;  %vm628_vm6 = vcmp.eq.f32.partialorder %v627_v8, 8.507059e+37 }
 0x1cd   :  { %v948_v0 = vpop.eup %947 }
 0x1ce   :  { %v950_v1 = vpop.eup %949  ;;  %v619_v2 = vmul.f32 %v948_v0, %v617_v63  ;;  %v43_v3 = vpop.xlane.xlu2 %42  ;;  %vm624_vm3 = vweird.f32 %v948_v0 }
 0x1cf   :  { %951 = vlog2.f32 %v43_v3  ;;  %v634_v5 = vmul.f32 0.6931472, %v950_v1  ;;  %vm625_vm5 = vmor %vm623_vm4, %vm624_vm3 }
 0x1d0   :  { %v620_v4 = vsub.f32 1.0, %v619_v2  ;;  %953 = vrcp.f32 %v974_v26 }
 0x1d1   :  { %v635_v11 = vsub.f32 %v612_v56, %v634_v5  ;;  %955 = vrcp.f32 %v975_v27 }
 0x1d2   :  { %v621_v7 = vmul.f32 %v948_v0, %v620_v4 }
 0x1d3   :  { %v637_v20 = vsub.f32 %v635_v11, %v636_v17 }
 0x1d4   :  { %v622_v10 = vadd.f32 %v948_v0, %v621_v7 }
 0x1d5   :  { %v952_v12 = vpop.eup %951 }
 0x1d6   :  { %v45_v14 = vmul.f32 0.6931472, %v952_v12  ;;  %v626_v15 = vsel %vm625_vm5, %v948_v0, %v622_v10  ;;  %v954_v28 = vpop.eup %953 }
 0x1d7   :  { %v631_v16 = vsel %vm628_vm6, %v630_v13, %v626_v15  ;;  %v956_v29 = vpop.eup %955  ;;  %v65_v30 = vmul.f32 8.0, %v954_v28  ;;  %vm69_vm8 = vweird.f32 %v954_v28 }
 0x1d8   :  { %v46_v18 = vsub.f32 %v38_v49, %v45_v14  ;;  %v632_v19 = vmul.f32 %v944_v59, %v631_v16  ;;  %v652_v31 = vmul.f32 800.0, %v956_v29  ;;  %vm656_vm9 = vweird.f32 %v956_v29 }
 0x1d9   :  { %v66_v32 = vsub.f32 1.0, %v65_v30 }
 0x1da   :  { %v52_v21 = vsel %vm51_vm7, %v46_v18, 0.0  ;;  %v638_v22 = vmul.f32 %v637_v20, %v632_v19  ;;  %v653_v35 = vsub.f32 1.0, %v652_v31 }
 0x1db   :  { %v53_v23 = vsel %vm28_vm1, %v52_v21, 0.0  ;;  %v67_v47 = vmul.f32 %v954_v28, %v66_v32 }
 0x1dc   :  { %54 = vadd.xlane.f32.xlu1 %v53_v23  ;;  %v639_v24 = vsel %vm32_vm2, %v638_v22, 0.0  ;;  %v654_v41 = vmul.f32 %v956_v29, %v653_v35 }
 0x1dd   :  { %v640_v25 = vsel %vm28_vm1, %v639_v24, 0.0  ;;  %v68_v44 = vadd.f32 %v954_v28, %v67_v47 }
 0x1de   :  { %641 = vadd.xlane.f32.xlu2 %v640_v25  ;;  %v655_v48 = vadd.f32 %v956_v29, %v654_v41 }
 0x1df   :  { %v70_v51 = vsel %vm69_vm8, %v954_v28, %v68_v44 }
 0x1e0   :  { %v657_v54 = vsel %vm656_vm9, %v956_v29, %v655_v48 }
 0x24f   :  { %v55_v33 = vpop.xlane.xlu1 %54 }
 0x250   :  { %v56_v34 = vrot.slane %v55_v33, 4 }
 0x251   :  { %v642_v36 = vpop.xlane.xlu2 %641 }
 0x252   :  { %v57_v37 = vadd.f32 %v56_v34, %v55_v33  ;;  %v643_v38 = vrot.slane %v642_v36, 4 }
 0x254   :  { %v58_v39 = vrot.slane %v57_v37, 2  ;;  %v644_v40 = vadd.f32 %v643_v38, %v642_v36 }
 0x256   :  { %v645_v42 = vrot.slane %v644_v40, 2  ;;  %v59_v43 = vadd.f32 %v58_v39, %v57_v37 }
 0x258   :  { %v646_v45 = vadd.f32 %v645_v42, %v644_v40  ;;  %v60_v46 = vrot.slane %v59_v43, 1 }
 0x25a   :  { %v61_v50 = vadd.f32 %v60_v46, %v59_v43  ;;  %v647_v52 = vrot.slane %v646_v45, 1 }
 0x25c   :  { %921 = vpush %v61_v50  ;;  %v648_v53 = vadd.f32 %v647_v52, %v646_v45 }
 0x25d   :  { %923 = vpush %v70_v51 }
 0x25e   :  { %925 = vpush %v648_v53 }
 0x25f   :  { %927 = vpush %v657_v54 }
 0x28d   :  { %s922_s0 = spop %921 }
 0x28e   :  { %s63_s29 = ssub.f32 0.0, %s922_s0  ;;  %s924_s30 = spop %923 }
 0x28f   :  { %s926_s7 = spop %925 }
 0x290   :  { %s72_s8 = smul.f32 %s924_s30, %s63_s29  ;;  %s928_s9 = spop %927 }
 0x291   :  { %s650_s10 = smul.f32 4.0, %s926_s7 }
 0x292   :  { %s661_s15 = smul.f32 0.5, %s72_s8 }
 0x293   :  { %s659_s11 = smul.f32 %s928_s9, %s650_s10 }
 0x295   :  { %s662_s16 = smul.f32 0.5, %s659_s11 }
 0x297   :  { %s663_s17 = sadd.f32 %s662_s16, %s661_s15 }
 0x299   :  { %665 = sst [smem:[#allocation5]] %s663_s17 }
 0x29a   :  { %674 = dma.smem_to_hbm %s976_s18, 16, %s672_s14, [#allocation6]  }
 0x29b   :  { %969 = dma.done.wait [#allocation6], 16  }
 0x29c   :  { %970 = vsyncadd [#allocation6], 4294967280 }
 0x29d   :  { %679 = sfence }
 0x29e   :  { %680 = vsyncpa [#allocation6], 1 }

</bundles_post_ra>
